<compile_context>
chip_gen: v7x
topology: tpu7x:2x2x1
jax: 0.10.0
libtpu: 0.0.40
codegen_flags: <defaults>
</compile_context>

<pallas_src>
import math

import jax
import jax.numpy as jnp
from jax import lax
from jax.experimental import pallas as pl
from jax.experimental.pallas import tpu as pltpu


_MASK_VALUE = -1e30  # large finite negative for masked (padded) key positions


def _round_up(x: int, m: int) -> int:
    return ((x + m - 1) // m) * m


def _largest_tile(total: int, cap: int, unit: int = 8) -> int:
    """Largest multiple of `unit` that divides `total` and is <= cap."""
    assert total % unit == 0 and total >= unit
    n = total // unit
    for d in range(min(n, max(cap // unit, 1)), 0, -1):
        if n % d == 0:
            return d * unit
    return unit


# ---------------------------------------------------------------------------
# Kernel 1: fused Q/K/V projections over a flattened (B*S_pad, Dp) slab.
# ---------------------------------------------------------------------------
def _proj_kernel(q_ref, k_ref, v_ref,
                 wq_ref, bq_ref, wk_ref, bk_ref, wv_ref, bv_ref,
                 qp_ref, kp_ref, vp_ref):
    # bf16 MXU operands, f32 accumulation, f32 bias add; outputs stored bf16.
    qp = jnp.dot(q_ref[...], wq_ref[...],
                 preferred_element_type=jnp.float32) + bq_ref[...]
    kp = jnp.dot(k_ref[...], wk_ref[...],
                 preferred_element_type=jnp.float32) + bk_ref[...]
    vp = jnp.dot(v_ref[...], wv_ref[...],
                 preferred_element_type=jnp.float32) + bv_ref[...]
    qp_ref[...] = qp.astype(qp_ref.dtype)
    kp_ref[...] = kp.astype(kp_ref.dtype)
    vp_ref[...] = vp.astype(vp_ref.dtype)


# ---------------------------------------------------------------------------
# Kernel 2a: single-KV-tile attention (whole key/value row resident in VMEM).
# ---------------------------------------------------------------------------
def _make_single_tile_kernel(s_valid: int, s_pad: int):
    need_mask = s_pad != s_valid

    def kernel(qp_ref, kp_ref, vp_ref, o_ref):
        # scores = qp @ kp^T (scale already folded into qp).
        s = lax.dot_general(qp_ref[...], kp_ref[...],
                            dimension_numbers=(((1,), (1,)), ((), ())),
                            preferred_element_type=jnp.float32)  # (tq, S_pad)
        if need_mask:
            col = lax.broadcasted_iota(jnp.int32, s.shape, 1)
            s = jnp.where(col < s_valid, s, _MASK_VALUE)

        m = jnp.max(s, axis=-1, keepdims=True)
        p = jnp.exp(s - m)
        denom = jnp.sum(p, axis=-1, keepdims=True)
        inv = pl.reciprocal(denom, approx=True)                  # EUP slot
        o = jnp.dot(p.astype(vp_ref.dtype), vp_ref[...],
                    preferred_element_type=jnp.float32)
        o_ref[...] = (o * inv).astype(o_ref.dtype)

    return kernel


# ---------------------------------------------------------------------------
# Kernel 2b: flash attention (online softmax) over padded (B, S_pad, Dp).
# ---------------------------------------------------------------------------
def _make_flash_kernel(s_valid: int, s_pad: int, tk: int):
    need_mask = s_pad != s_valid

    def kernel(qp_ref, kp_ref, vp_ref, o_ref, m_sc, l_sc, acc_sc):
        kv = pl.program_id(2)

        @pl.when(kv == 0)
        def _():
            m_sc[...] = jnp.full_like(m_sc, _MASK_VALUE)
            l_sc[...] = jnp.zeros_like(l_sc)
            acc_sc[...] = jnp.zeros_like(acc_sc)

        # scores = qp @ kp^T (scale already folded into qp); contract the
        # embedding axes directly -- no explicit transpose of kp.
        s = lax.dot_general(qp_ref[...], kp_ref[...],
                            dimension_numbers=(((1,), (1,)), ((), ())),
                            preferred_element_type=jnp.float32)  # (tq, tk)

        if need_mask:
            col = kv * tk + lax.broadcasted_iota(jnp.int32, s.shape, 1)
            s = jnp.where(col < s_valid, s, _MASK_VALUE)

        # Online softmax update, all statistics in f32.
        m_prev = m_sc[...]
        m_new = jnp.maximum(m_prev, jnp.max(s, axis=-1, keepdims=True))
        alpha = jnp.exp(m_prev - m_new)
        p = jnp.exp(s - m_new)
        l_sc[...] = alpha * l_sc[...] + jnp.sum(p, axis=-1, keepdims=True)
        acc_sc[...] = alpha * acc_sc[...] + jnp.dot(
            p.astype(vp_ref.dtype), vp_ref[...],
            preferred_element_type=jnp.float32)
        m_sc[...] = m_new

        @pl.when(kv == pl.num_programs(2) - 1)
        def _():
            inv_l = pl.reciprocal(l_sc[...], approx=True)  # EUP slot, ~free
            o_ref[...] = (acc_sc[...] * inv_l).astype(o_ref.dtype)

    return kernel


# ---------------------------------------------------------------------------
# Wrapper
# ---------------------------------------------------------------------------
def attention_pallas(q, k, v, wq_t, bq, wk_t, bk, wv_t, bv):
    """q, k, v: (B, S, D) f32.  wX_t: (D, D) pre-transposed (D_in, D_out).
    bX: (1, D).  Returns (B, S, D) f32."""
    B, S, D = q.shape
    scale = 1.0 / math.sqrt(D)

    # Lane-dense / (8,128)-friendly padded shapes and tile sizes.
    Dp = _round_up(D, 128)
    S8 = _round_up(S, 8)
    if S8 >= 128:
        tq = 128
        S_pad = _round_up(S8, tq)
        # Larger KV tiles amortize per-grid-step overhead (still lane-dense).
        tk = _largest_tile(S_pad, 512, 128)
    else:
        tq = S8            # sublane-aligned, whole (short) sequence per tile
        S_pad = S8
        tk = S8

    bf16 = jnp.bfloat16

    def pad_act(x):
        return jnp.pad(x, ((0, 0), (0, S_pad - S), (0, Dp - D))).astype(bf16)

    def pad_w(w):
        return jnp.pad(w, ((0, Dp - D), (0, Dp - D))).astype(bf16)

    def pad_b(b):
        return jnp.pad(b, ((0, 0), (0, Dp - D))).astype(jnp.float32)

    q_p, k_p, v_p = pad_act(q), pad_act(k), pad_act(v)

    # Fold the 1/sqrt(D) scale into the query projection parameters.
    wq_p, bq_p = pad_w(wq_t * scale), pad_b(bq * scale)
    wk_p, bk_p = pad_w(wk_t), pad_b(bk)
    wv_p, bv_p = pad_w(wv_t), pad_b(bv)

    # ---------------- Kernel 1: projections over (B*S_pad, Dp) -------------
    M = B * S_pad
    tm = _largest_tile(M, 512)   # big M per MXU pass; divides M exactly
    q2 = q_p.reshape(M, Dp)
    k2 = k_p.reshape(M, Dp)
    v2 = v_p.reshape(M, Dp)

    act_spec = pl.BlockSpec((tm, Dp), lambda i: (i, 0))
    w_spec = pl.BlockSpec((Dp, Dp), lambda i: (0, 0))
    b_spec = pl.BlockSpec((1, Dp), lambda i: (0, 0))

    # Explicit VMEM budget: 2x double-buffering on pipelined blocks + resident
    # weights/biases, with 2x headroom, clamped to a cross-generation-safe cap.
    proj_est = (2 * 3 * tm * Dp * 2          # input blocks (bf16), 2 buffers
                + 2 * 3 * tm * Dp * 2        # output blocks (bf16), 2 buffers
                + 2 * 3 * Dp * Dp * 2        # weights (bf16)
                + 2 * 3 * 8 * Dp * 4)        # biases (f32, sublane-padded)
    proj_limit = int(min(48 * 2**20, max(16 * 2**20, 2 * proj_est)))

    qp, kp, vp = pl.pallas_call(
        _proj_kernel,
        out_shape=tuple(jax.ShapeDtypeStruct((M, Dp), bf16) for _ in range(3)),
        grid_spec=pltpu.PrefetchScalarGridSpec(
            num_scalar_prefetch=0,
            grid=(M // tm,),
            in_specs=[act_spec, act_spec, act_spec,
                      w_spec, b_spec, w_spec, b_spec, w_spec, b_spec],
            out_specs=[act_spec, act_spec, act_spec],
        ),
        compiler_params=pltpu.CompilerParams(
            dimension_semantics=("parallel",),
            vmem_limit_bytes=proj_limit),
    )(q2, k2, v2, wq_p, bq_p, wk_p, bk_p, wv_p, bv_p)

    qp = qp.reshape(B, S_pad, Dp)
    kp = kp.reshape(B, S_pad, Dp)
    vp = vp.reshape(B, S_pad, Dp)

    # ---------------- Kernel 2: attention -----------------------------------
    n_q = S_pad // tq
    n_kv = S_pad // tk

    if n_kv == 1:
        # Fast path: the whole (padded) KV fits in a single VMEM tile -> plain
        # in-register softmax, no scratch, no online-softmax bookkeeping.
        q_spec = pl.BlockSpec((pl.Squeezed(), tq, Dp), lambda b, qi: (b, qi, 0))
        kv_spec = pl.BlockSpec((pl.Squeezed(), S_pad, Dp), lambda b, qi: (b, 0, 0))
        o_spec = pl.BlockSpec((pl.Squeezed(), tq, Dp), lambda b, qi: (b, qi, 0))

        attn_est = (2 * tq * Dp * 2              # qp block (bf16), 2 buffers
                    + 2 * 2 * S_pad * Dp * 2     # kp, vp blocks (bf16)
                    + 2 * tq * Dp * 4)           # output block (f32)
        attn_limit = int(min(48 * 2**20, max(16 * 2**20, 2 * attn_est)))

        out = pl.pallas_call(
            _make_single_tile_kernel(S, S_pad),
            out_shape=jax.ShapeDtypeStruct((B, S_pad, Dp), jnp.float32),
            grid_spec=pltpu.PrefetchScalarGridSpec(
                num_scalar_prefetch=0,
                grid=(B, n_q),
                in_specs=[q_spec, kv_spec, kv_spec],
                out_specs=o_spec,
            ),
            compiler_params=pltpu.CompilerParams(
                dimension_semantics=("parallel", "parallel"),
                vmem_limit_bytes=attn_limit),
        )(qp, kp, vp)
    else:
        # General flash-attention path with KV as an "arbitrary" reduction axis.
        q_spec = pl.BlockSpec((pl.Squeezed(), tq, Dp), lambda b, qi, ki: (b, qi, 0))
        kv_spec = pl.BlockSpec((pl.Squeezed(), tk, Dp), lambda b, qi, ki: (b, ki, 0))
        o_spec = pl.BlockSpec((pl.Squeezed(), tq, Dp), lambda b, qi, ki: (b, qi, 0))

        flash_est = (2 * tq * Dp * 2             # qp block (bf16), 2 buffers
                     + 2 * 2 * tk * Dp * 2       # kp, vp blocks
                     + 2 * tq * Dp * 4           # output block (f32)
                     + tq * Dp * 4               # acc scratch
                     + 2 * tq * 128 * 4)         # m, l scratch (lane-padded)
        flash_limit = int(min(48 * 2**20, max(16 * 2**20, 2 * flash_est)))

        out = pl.pallas_call(
            _make_flash_kernel(S, S_pad, tk),
            out_shape=jax.ShapeDtypeStruct((B, S_pad, Dp), jnp.float32),
            grid_spec=pltpu.PrefetchScalarGridSpec(
                num_scalar_prefetch=0,
                grid=(B, n_q, n_kv),
                in_specs=[q_spec, kv_spec, kv_spec],
                out_specs=o_spec,
                scratch_shapes=[pltpu.VMEM((tq, 1), jnp.float32),   # m
                                pltpu.VMEM((tq, 1), jnp.float32),   # l
                                pltpu.VMEM((tq, Dp), jnp.float32)], # acc
            ),
            compiler_params=pltpu.CompilerParams(
                dimension_semantics=("parallel", "parallel", "arbitrary"),
                vmem_limit_bytes=flash_limit),
        )(qp, kp, vp)

    return out[:, :S, :D]


def _reference(q, k, v, wq_t, bq, wk_t, bk, wv_t, bv):
    # Pure-JAX f32 reference mirroring the PyTorch forward.
    dim = q.shape[-1]
    kp = k @ wk_t + bk
    qp = q @ wq_t + bq
    vp = v @ wv_t + bv
    att = jnp.einsum("bsd,btd->bst", qp, kp) / math.sqrt(dim)
    att = jax.nn.softmax(att, axis=-1)
    return att @ vp


if __name__ == "__main__":
    B, S, D = 2, 8, 32
    key = jax.random.PRNGKey(0)
    keys = jax.random.split(key, 9)

    q = jax.random.normal(keys[0], (B, S, D), dtype=jnp.float32)
    k = jax.random.normal(keys[1], (B, S, D), dtype=jnp.float32)
    v = jax.random.normal(keys[2], (B, S, D), dtype=jnp.float32)

    # Deterministic parameter init (analogous to nn.Linear's uniform init).
    bound = 1.0 / math.sqrt(D)
    wq_t = jax.random.uniform(keys[3], (D, D), jnp.float32, -bound, bound)
    wk_t = jax.random.uniform(keys[4], (D, D), jnp.float32, -bound, bound)
    wv_t = jax.random.uniform(keys[5], (D, D), jnp.float32, -bound, bound)
    bq = jax.random.uniform(keys[6], (1, D), jnp.float32, -bound, bound)
    bk = jax.random.uniform(keys[7], (1, D), jnp.float32, -bound, bound)
    bv = jax.random.uniform(keys[8], (1, D), jnp.float32, -bound, bound)

    out = attention_pallas(q, k, v, wq_t, bq, wk_t, bk, wv_t, bv)
    out = jax.block_until_ready(out)

    ref = _reference(q, k, v, wq_t, bq, wk_t, bk, wv_t, bv)
    assert out.shape == (B, S, D)
    # bf16 MXU operands (+ approx reciprocal) => compare at bf16-level tolerance.
    assert jnp.allclose(out, ref, atol=5e-2, rtol=5e-2), "mismatch vs reference"

    print("KERNEL_OK")
</pallas_src>

<mosaic_0001>
module attributes {stable_mosaic.version = 11 : i64} {
  func.func @_proj_kernel(%arg0: i32, %arg1: memref<16x128xbf16, #tpu.memory_space<vmem>>, %arg2: memref<16x128xbf16, #tpu.memory_space<vmem>>, %arg3: memref<16x128xbf16, #tpu.memory_space<vmem>>, %arg4: memref<128x128xbf16, #tpu.memory_space<vmem>>, %arg5: memref<1x128xf32, #tpu.memory_space<vmem>>, %arg6: memref<128x128xbf16, #tpu.memory_space<vmem>>, %arg7: memref<1x128xf32, #tpu.memory_space<vmem>>, %arg8: memref<128x128xbf16, #tpu.memory_space<vmem>>, %arg9: memref<1x128xf32, #tpu.memory_space<vmem>>, %arg10: memref<16x128xbf16, #tpu.memory_space<vmem>>, %arg11: memref<16x128xbf16, #tpu.memory_space<vmem>>, %arg12: memref<16x128xbf16, #tpu.memory_space<vmem>>) attributes {dimension_semantics = [#tpu.dimension_semantics<parallel>], iteration_bounds = array<i64: 1>, scalar_prefetch = 0 : i64, scratch_operands = 0 : i64, tpu.core_type = #tpu.core_type<tc>, window_params = [{transform_indices = @transform_0, window_bounds = array<i64: 16, 128>}, {transform_indices = @transform_1, window_bounds = array<i64: 16, 128>}, {transform_indices = @transform_2, window_bounds = array<i64: 16, 128>}, {pipeline_mode = #tpu.pipeline_mode<synchronous>, transform_indices = @transform_3, window_bounds = array<i64: 128, 128>}, {pipeline_mode = #tpu.pipeline_mode<synchronous>, transform_indices = @transform_4, window_bounds = array<i64: 1, 128>}, {pipeline_mode = #tpu.pipeline_mode<synchronous>, transform_indices = @transform_5, window_bounds = array<i64: 128, 128>}, {pipeline_mode = #tpu.pipeline_mode<synchronous>, transform_indices = @transform_6, window_bounds = array<i64: 1, 128>}, {pipeline_mode = #tpu.pipeline_mode<synchronous>, transform_indices = @transform_7, window_bounds = array<i64: 128, 128>}, {pipeline_mode = #tpu.pipeline_mode<synchronous>, transform_indices = @transform_8, window_bounds = array<i64: 1, 128>}, {transform_indices = @transform_9, window_bounds = array<i64: 16, 128>}, {transform_indices = @transform_10, window_bounds = array<i64: 16, 128>}, {transform_indices = @transform_11, window_bounds = array<i64: 16, 128>}]} {
    %c0 = arith.constant 0 : index
    %c0_0 = arith.constant 0 : index
    %0 = vector.load %arg1[%c0, %c0_0] : memref<16x128xbf16, #tpu.memory_space<vmem>>, vector<16x128xbf16>
    %c0_1 = arith.constant 0 : index
    %c0_2 = arith.constant 0 : index
    %1 = vector.load %arg4[%c0_1, %c0_2] : memref<128x128xbf16, #tpu.memory_space<vmem>>, vector<128x128xbf16>
    %cst = arith.constant dense<0.000000e+00> : vector<16x128xf32>
    %2 = tpu.matmul %0, %1, %cst {dimension_numbers = #tpu.dot_dimension_numbers<[1], [0], [0], [1], [0, 0, 1, 1], [], []>} : vector<16x128xbf16>, vector<128x128xbf16>, vector<16x128xf32> -> vector<16x128xf32>
    %c0_3 = arith.constant 0 : index
    %c0_4 = arith.constant 0 : index
    %3 = vector.load %arg5[%c0_3, %c0_4] : memref<1x128xf32, #tpu.memory_space<vmem>>, vector<1x128xf32>
    %4 = vector.broadcast %3 : vector<1x128xf32> to vector<16x128xf32>
    %5 = arith.addf %2, %4 : vector<16x128xf32>
    %c0_5 = arith.constant 0 : index
    %c0_6 = arith.constant 0 : index
    %6 = vector.load %arg2[%c0_5, %c0_6] : memref<16x128xbf16, #tpu.memory_space<vmem>>, vector<16x128xbf16>
    %c0_7 = arith.constant 0 : index
    %c0_8 = arith.constant 0 : index
    %7 = vector.load %arg6[%c0_7, %c0_8] : memref<128x128xbf16, #tpu.memory_space<vmem>>, vector<128x128xbf16>
    %cst_9 = arith.constant dense<0.000000e+00> : vector<16x128xf32>
    %8 = tpu.matmul %6, %7, %cst_9 {dimension_numbers = #tpu.dot_dimension_numbers<[1], [0], [0], [1], [0, 0, 1, 1], [], []>} : vector<16x128xbf16>, vector<128x128xbf16>, vector<16x128xf32> -> vector<16x128xf32>
    %c0_10 = arith.constant 0 : index
    %c0_11 = arith.constant 0 : index
    %9 = vector.load %arg7[%c0_10, %c0_11] : memref<1x128xf32, #tpu.memory_space<vmem>>, vector<1x128xf32>
    %10 = vector.broadcast %9 : vector<1x128xf32> to vector<16x128xf32>
    %11 = arith.addf %8, %10 : vector<16x128xf32>
    %c0_12 = arith.constant 0 : index
    %c0_13 = arith.constant 0 : index
    %12 = vector.load %arg3[%c0_12, %c0_13] : memref<16x128xbf16, #tpu.memory_space<vmem>>, vector<16x128xbf16>
    %c0_14 = arith.constant 0 : index
    %c0_15 = arith.constant 0 : index
    %13 = vector.load %arg8[%c0_14, %c0_15] : memref<128x128xbf16, #tpu.memory_space<vmem>>, vector<128x128xbf16>
    %cst_16 = arith.constant dense<0.000000e+00> : vector<16x128xf32>
    %14 = tpu.matmul %12, %13, %cst_16 {dimension_numbers = #tpu.dot_dimension_numbers<[1], [0], [0], [1], [0, 0, 1, 1], [], []>} : vector<16x128xbf16>, vector<128x128xbf16>, vector<16x128xf32> -> vector<16x128xf32>
    %c0_17 = arith.constant 0 : index
    %c0_18 = arith.constant 0 : index
    %15 = vector.load %arg9[%c0_17, %c0_18] : memref<1x128xf32, #tpu.memory_space<vmem>>, vector<1x128xf32>
    %16 = vector.broadcast %15 : vector<1x128xf32> to vector<16x128xf32>
    %17 = arith.addf %14, %16 : vector<16x128xf32>
    %18 = arith.truncf %5 : vector<16x128xf32> to vector<16x128xbf16>
    %c0_19 = arith.constant 0 : index
    %c0_20 = arith.constant 0 : index
    %19 = vector.load %arg10[%c0_19, %c0_20] : memref<16x128xbf16, #tpu.memory_space<vmem>>, vector<16x128xbf16>
    tpu.vector_store %arg10[%c0_19, %c0_20], %18 {strides = array<i32>} : memref<16x128xbf16, #tpu.memory_space<vmem>>, vector<16x128xbf16>,
    %20 = arith.truncf %11 : vector<16x128xf32> to vector<16x128xbf16>
    %c0_21 = arith.constant 0 : index
    %c0_22 = arith.constant 0 : index
    %21 = vector.load %arg11[%c0_21, %c0_22] : memref<16x128xbf16, #tpu.memory_space<vmem>>, vector<16x128xbf16>
    tpu.vector_store %arg11[%c0_21, %c0_22], %20 {strides = array<i32>} : memref<16x128xbf16, #tpu.memory_space<vmem>>, vector<16x128xbf16>,
    %22 = arith.truncf %17 : vector<16x128xf32> to vector<16x128xbf16>
    %c0_23 = arith.constant 0 : index
    %c0_24 = arith.constant 0 : index
    %23 = vector.load %arg12[%c0_23, %c0_24] : memref<16x128xbf16, #tpu.memory_space<vmem>>, vector<16x128xbf16>
    tpu.vector_store %arg12[%c0_23, %c0_24], %22 {strides = array<i32>} : memref<16x128xbf16, #tpu.memory_space<vmem>>, vector<16x128xbf16>,
    return
  }
  func.func @transform_0(%arg0: i32) -> (i32, i32) {
    %c0_i32 = arith.constant 0 : i32
    %c0_i32_0 = arith.constant 0 : i32
    return %arg0, %c0_i32 : i32, i32
  }
  func.func @transform_1(%arg0: i32) -> (i32, i32) {
    %c0_i32 = arith.constant 0 : i32
    %c0_i32_0 = arith.constant 0 : i32
    return %arg0, %c0_i32 : i32, i32
  }
  func.func @transform_2(%arg0: i32) -> (i32, i32) {
    %c0_i32 = arith.constant 0 : i32
    %c0_i32_0 = arith.constant 0 : i32
    return %arg0, %c0_i32 : i32, i32
  }
  func.func @transform_3(%arg0: i32) -> (i32, i32) {
    %c0_i32 = arith.constant 0 : i32
    %c0_i32_0 = arith.constant 0 : i32
    %c0_i32_1 = arith.constant 0 : i32
    return %c0_i32, %c0_i32_0 : i32, i32
  }
  func.func @transform_4(%arg0: i32) -> (i32, i32) {
    %c0_i32 = arith.constant 0 : i32
    %c0_i32_0 = arith.constant 0 : i32
    %c0_i32_1 = arith.constant 0 : i32
    return %c0_i32, %c0_i32_0 : i32, i32
  }
  func.func @transform_5(%arg0: i32) -> (i32, i32) {
    %c0_i32 = arith.constant 0 : i32
    %c0_i32_0 = arith.constant 0 : i32
    %c0_i32_1 = arith.constant 0 : i32
    return %c0_i32, %c0_i32_0 : i32, i32
  }
  func.func @transform_6(%arg0: i32) -> (i32, i32) {
    %c0_i32 = arith.constant 0 : i32
    %c0_i32_0 = arith.constant 0 : i32
    %c0_i32_1 = arith.constant 0 : i32
    return %c0_i32, %c0_i32_0 : i32, i32
  }
  func.func @transform_7(%arg0: i32) -> (i32, i32) {
    %c0_i32 = arith.constant 0 : i32
    %c0_i32_0 = arith.constant 0 : i32
    %c0_i32_1 = arith.constant 0 : i32
    return %c0_i32, %c0_i32_0 : i32, i32
  }
  func.func @transform_8(%arg0: i32) -> (i32, i32) {
    %c0_i32 = arith.constant 0 : i32
    %c0_i32_0 = arith.constant 0 : i32
    %c0_i32_1 = arith.constant 0 : i32
    return %c0_i32, %c0_i32_0 : i32, i32
  }
  func.func @transform_9(%arg0: i32) -> (i32, i32) {
    %c0_i32 = arith.constant 0 : i32
    %c0_i32_0 = arith.constant 0 : i32
    return %arg0, %c0_i32 : i32, i32
  }
  func.func @transform_10(%arg0: i32) -> (i32, i32) {
    %c0_i32 = arith.constant 0 : i32
    %c0_i32_0 = arith.constant 0 : i32
    return %arg0, %c0_i32 : i32, i32
  }
  func.func @transform_11(%arg0: i32) -> (i32, i32) {
    %c0_i32 = arith.constant 0 : i32
    %c0_i32_0 = arith.constant 0 : i32
    return %arg0, %c0_i32 : i32, i32
  }
}

</mosaic_0001>

<bundles_post_ra>
// kernel: tpu_custom_call.1
= control target key start
LH: loop header
LB: loop body
LE: loop exit
PB: predicated region body
PF: predicated region fallthrough
CT: control target
= control target key end

     0   :  { %17 = vsyncpa [#allocation3], 0  ;;  %s1223_s0 = inlined_call_operand.hbm [shape: bf16[16,128], index: 0, kind: input, shape index: {}]   ;;  %s1224_s1 = inlined_call_operand.hbm [shape: bf16[16,128], index: 1, kind: input, shape index: {}]   ;;  %s1225_s2 = inlined_call_operand.hbm [shape: bf16[16,128], index: 2, kind: input, shape index: {}]   ;;  %s1226_s3 = inlined_call_operand.hbm [shape: bf16[128,128], index: 3, kind: input, shape index: {}]   ;;  %s1227_s4 = inlined_call_operand.vmem [shape: f32[1,128], index: 4, kind: input, shape index: {}]   ;;  %s1228_s5 = inlined_call_operand.hbm [shape: bf16[128,128], index: 5, kind: input, shape index: {}]   ;;  %s1229_s6 = inlined_call_operand.vmem [shape: f32[1,128], index: 6, kind: input, shape index: {}]   ;;  %s1230_s7 = inlined_call_operand.hbm [shape: bf16[128,128], index: 7, kind: input, shape index: {}]   ;;  %s1231_s8 = inlined_call_operand.vmem [shape: f32[1,128], index: 8, kind: input, shape index: {}]   ;;  %s1232_s9 = inlined_call_operand.hbm [shape: bf16[16,128], index: 9, kind: output, shape index: {0}]   ;;  %s1233_s10 = inlined_call_operand.hbm [shape: bf16[16,128], index: 10, kind: output, shape index: {1}]   ;;  %s1234_s11 = inlined_call_operand.hbm [shape: bf16[16,128], index: 11, kind: output, shape index: {2}]  }
   0x1   :  { %18 = vsyncpa [#allocation6], 0 }
   0x2   :  { %19 = vsyncpa [#allocation9], 0 }
   0x3   :  { %20 = vsyncpa [#allocation12], 0 }
   0x4   :  { %21 = vsyncpa [#allocation4], 0 }
   0x5   :  { %22 = vsyncpa [#allocation15], 0  ;;  %s955_s17 = smov [#allocation5]   ;;  %s956_s19 = smov [#allocation8]  }
   0x6   :  { %s40_s18 = sshll.u32 %s955_s17, 4  ;;  %s64_s20 = sshll.u32 %s956_s19, 4  ;;  %s41_s18 = int_to_ptr.vmem [resolvable:$true] %s40_s18  ;;  %s1028_s20 = int_to_ptr.vmem [resolvable:$true] %s64_s20 }
   0x7   :  { %s745_s23 = scalar_lea.hbm %s1224_s1, 128 }
   0x8   :  { %p746_p0 = scmp.ne.s32.totalorder %s1224_s1, %s745_s23  ;;  %p749_p1 = scmp.lt.u32.totalorder %s745_s23, %s1224_s1 }
   0xa   :  { %p751_p2 = pnand %p749_p1, %p746_p0 }
   0xc   :  { %754 = shalt.err (!%p751_p2)
}
   0xd   :  { %s755_s28 = scalar_lea.vmem %s41_s18, 128  ;;  %p760_p4 = scmp.lt.s32.totalorder %s41_s18, %s41_s18 }
   0xe   :  { %p756_p3 = scmp.ne.s32.totalorder %s41_s18, %s755_s28  ;;  %p761_p5 = scmp.lt.s32.totalorder %s755_s28, %s755_s28 }
  0x10   :  { %p762_p6 = por %p761_p5, %p760_p4 }
  0x12   :  { %p763_p7 = pnand %p762_p6, %p756_p3 }
  0x14   :  { %766 = shalt.err (!%p763_p7)
}
  0x15   :  { %s957_s29 = smov 64   ;;  %s958_s30 = smov 4  }
  0x16   :  { %46 = dma.hbm_to_vmem [thread:$0]  %s1224_s1, 128, %s41_s18, [#allocation6], %s957_s29, %s957_s29, %s958_s30  }
  0x17   :  { %s767_s16 = scalar_lea.hbm %s1226_s3, 1024 }
  0x18   :  { %p768_p8 = scmp.ne.s32.totalorder %s1226_s3, %s767_s16  ;;  %p771_p9 = scmp.lt.u32.totalorder %s767_s16, %s1226_s3 }
  0x1a   :  { %p773_p10 = pnand %p771_p9, %p768_p8 }
  0x1c   :  { %776 = shalt.err (!%p773_p10)
}
  0x1d   :  { %s777_s23 = scalar_lea.vmem %s1028_s20, 1024  ;;  %p782_p12 = scmp.lt.s32.totalorder %s1028_s20, %s1028_s20 }
  0x1e   :  { %p778_p11 = scmp.ne.s32.totalorder %s1028_s20, %s777_s23  ;;  %p783_p13 = scmp.lt.s32.totalorder %s777_s23, %s777_s23 }
  0x20   :  { %p784_p0 = por %p783_p13, %p782_p12 }
  0x22   :  { %p785_p1 = pnand %p784_p0, %p778_p11 }
  0x24   :  { %788 = shalt.err (!%p785_p1)
}
  0x25   :  { %70 = dma.hbm_to_vmem [thread:$0]  %s1226_s3, 1024, %s1028_s20, [#allocation9], %s957_s29, %s957_s29, %s958_s30  }
  0x26   :  { %s959_s24 = smov [#allocation2]   ;;  %s960_s26 = smov [#allocation7]  }
  0x27   :  { %s28_s25 = sshll.u32 %s959_s24, 4  ;;  %s52_s27 = sshll.u32 %s960_s26, 4  ;;  %s29_s25 = int_to_ptr.vmem [resolvable:$true] %s28_s25  ;;  %s1065_s27 = int_to_ptr.vmem [resolvable:$true] %s52_s27 }
  0x28   :  { %s789_s13 = scalar_lea.hbm %s1223_s0, 128 }
  0x29   :  { %p790_p2 = scmp.ne.s32.totalorder %s1223_s0, %s789_s13  ;;  %p793_p3 = scmp.lt.u32.totalorder %s789_s13, %s1223_s0 }
  0x2b   :  { %p795_p4 = pnand %p793_p3, %p790_p2 }
  0x2d   :  { %798 = shalt.err (!%p795_p4)
}
  0x2e   :  { %s799_s3 = scalar_lea.vmem %s29_s25, 128  ;;  %p804_p6 = scmp.lt.s32.totalorder %s29_s25, %s29_s25 }
  0x2f   :  { %p800_p5 = scmp.ne.s32.totalorder %s29_s25, %s799_s3  ;;  %p805_p7 = scmp.lt.s32.totalorder %s799_s3, %s799_s3 }
  0x31   :  { %p806_p8 = por %p805_p7, %p804_p6 }
  0x33   :  { %p807_p9 = pnand %p806_p8, %p800_p5 }
  0x35   :  { %810 = shalt.err (!%p807_p9)
}
  0x36   :  { %34 = dma.hbm_to_vmem [thread:$0]  %s1223_s0, 128, %s29_s25, [#allocation3], %s957_s29, %s957_s29, %s958_s30  }
  0x37   :  { %s811_s23 = scalar_lea.hbm %s1225_s2, 128 }
  0x38   :  { %p812_p10 = scmp.ne.s32.totalorder %s1225_s2, %s811_s23  ;;  %p815_p11 = scmp.lt.u32.totalorder %s811_s23, %s1225_s2 }
  0x3a   :  { %p817_p12 = pnand %p815_p11, %p812_p10 }
  0x3c   :  { %820 = shalt.err (!%p817_p12)
}
  0x3d   :  { %s821_s28 = scalar_lea.vmem %s1065_s27, 128  ;;  %p826_p0 = scmp.lt.s32.totalorder %s1065_s27, %s1065_s27 }
  0x3e   :  { %p822_p13 = scmp.ne.s32.totalorder %s1065_s27, %s821_s28  ;;  %p827_p1 = scmp.lt.s32.totalorder %s821_s28, %s821_s28 }
  0x40   :  { %p828_p2 = por %p827_p1, %p826_p0 }
  0x42   :  { %p829_p3 = pnand %p828_p2, %p822_p13 }
  0x44   :  { %832 = shalt.err (!%p829_p3)
}
  0x45   :  { %58 = dma.hbm_to_vmem [thread:$0]  %s1225_s2, 128, %s1065_s27, [#allocation6], %s957_s29, %s957_s29, %s958_s30  }
  0x46   :  { %s961_s12 = smov [#allocation10]   ;;  %s962_s14 = smov [#allocation11]  }
  0x47   :  { %s78_s13 = sshll.u32 %s961_s12, 4  ;;  %s92_s15 = sshll.u32 %s962_s14, 4  ;;  %s79_s13 = int_to_ptr.vmem [resolvable:$true] %s78_s13  ;;  %s1102_s15 = int_to_ptr.vmem [resolvable:$true] %s92_s15 }
  0x48   :  { %s833_s3 = scalar_lea.hbm %s1228_s5, 1024 }
  0x49   :  { %p834_p4 = scmp.ne.s32.totalorder %s1228_s5, %s833_s3  ;;  %p837_p5 = scmp.lt.u32.totalorder %s833_s3, %s1228_s5 }
  0x4b   :  { %p839_p6 = pnand %p837_p5, %p834_p4 }
  0x4d   :  { %842 = shalt.err (!%p839_p6)
}
  0x4e   :  { %s843_s2 = scalar_lea.vmem %s79_s13, 1024  ;;  %p848_p8 = scmp.lt.s32.totalorder %s79_s13, %s79_s13 }
  0x4f   :  { %p844_p7 = scmp.ne.s32.totalorder %s79_s13, %s843_s2  ;;  %p849_p9 = scmp.lt.s32.totalorder %s843_s2, %s843_s2 }
  0x51   :  { %p850_p10 = por %p849_p9, %p848_p8 }
  0x53   :  { %p851_p11 = pnand %p850_p10, %p844_p7 }
  0x55   :  { %854 = shalt.err (!%p851_p11)
}
  0x56   :  { %84 = dma.hbm_to_vmem [thread:$0]  %s1228_s5, 1024, %s79_s13, [#allocation9], %s957_s29, %s957_s29, %s958_s30  }
  0x57   :  { %s855_s24 = scalar_lea.hbm %s1230_s7, 1024 }
  0x58   :  { %p856_p12 = scmp.ne.s32.totalorder %s1230_s7, %s855_s24  ;;  %p859_p13 = scmp.lt.u32.totalorder %s855_s24, %s1230_s7 }
  0x5a   :  { %p861_p0 = pnand %p859_p13, %p856_p12 }
  0x5c   :  { %864 = shalt.err (!%p861_p0)
}
  0x5d   :  { %s865_s12 = scalar_lea.vmem %s1102_s15, 1024  ;;  %p870_p2 = scmp.lt.s32.totalorder %s1102_s15, %s1102_s15 }
  0x5e   :  { %p866_p1 = scmp.ne.s32.totalorder %s1102_s15, %s865_s12  ;;  %p871_p3 = scmp.lt.s32.totalorder %s865_s12, %s865_s12 }
  0x60   :  { %p872_p4 = por %p871_p3, %p870_p2 }
  0x62   :  { %p873_p5 = pnand %p872_p4, %p866_p1 }
  0x64   :  { %876 = shalt.err (!%p873_p5)
}
  0x65   :  { %98 = dma.hbm_to_vmem [thread:$0]  %s1230_s7, 1024, %s1102_s15, [#allocation12], %s957_s29, %s957_s29, %s958_s30  }
  0x66   :  { %943 = dma.done.wait [#allocation3], 128  }
  0x67   :  { %944 = vsyncadd [#allocation3], 4294967168 }
  0x68   :  { %945 = dma.done.wait [#allocation6], 256  }
  0x69   :  { %946 = vsyncadd [#allocation6], 4294967040 }
  0x6a   :  { %947 = dma.done.wait [#allocation9], 2048  }
  0x6b   :  { %948 = vsyncadd [#allocation9], 4294965248 }
  0x6c   :  { %949 = dma.done.wait [#allocation12], 1024  }
  0x6d   :  { %950 = vsyncadd [#allocation12], 4294966272  ;;  %v963_v0 = vmov 0.0   ;;  %vm964_vm0 = vmmov 0   ;;  %v718_v1 = vld [vmem:[#allocation8] sm:$0xff]   ;;  %v719_v2 = vld [vmem:[#allocation8 + $0x8] sm:$0xff]  }
  0x6e   :  { %645 = vmatprep.subr.bf16.mxu0 %v963_v0  ;;  %665 = vmatprep.subr.bf16.mxu1 %v963_v0  ;;  %v720_v3 = vld [vmem:[#allocation8 + $0x10] sm:$0xff]   ;;  %v726_v4 = vld [vmem:[#allocation10] sm:$0xff]   ;;  %v721_v5 = vld [vmem:[#allocation8 + $0x18] sm:$0xff]   ;;  %s965_s15 = smov [#allocation13]  }
  0x6f   :  { %661 = vmatprep.mubr.msk.bf16.mxu0 %vm964_vm0, %v963_v0  ;;  %681 = vmatprep.mubr.msk.bf16.mxu1 %vm964_vm0, %v963_v0  ;;  %v728_v6 = vld [vmem:[#allocation10 + $0x8] sm:$0xff]   ;;  %v722_v7 = vld [vmem:[#allocation8 + $0x20] sm:$0xff]   ;;  %v730_v8 = vld [vmem:[#allocation10 + $0x10] sm:$0xff]   ;;  %s515_s16 = sshll.u32 %s965_s15, 4  ;;  %s516_s16 = int_to_ptr.vmem [resolvable:$true] %s515_s16 }
  0x70   :  { %646 = vmatpush3.bf16.msra.mxu0 %v718_v1  ;;  %666 = vmatpush3.bf16.msra.mxu1 %v726_v4  ;;  %v723_v9 = vld [vmem:[#allocation8 + $0x28] sm:$0xff]   ;;  %v732_v10 = vld [vmem:[#allocation10 + $0x18] sm:$0xff]   ;;  %v724_v11 = vld [vmem:[#allocation8 + $0x30] sm:$0xff]   ;;  %s877_s20 = scalar_lea.vmem %s516_s16, 128  ;;  %p882_p7 = scmp.lt.s32.totalorder %s516_s16, %s516_s16 }
  0x71   :  { %647 = vmatprep.subr.bf16.mxu0 %v963_v0  ;;  %667 = vmatprep.subr.bf16.mxu1 %v963_v0  ;;  %v734_v12 = vld [vmem:[#allocation10 + $0x20] sm:$0xff]   ;;  %v725_v13 = vld [vmem:[#allocation8 + $0x38] sm:$0xff]   ;;  %v736_v14 = vld [vmem:[#allocation10 + $0x28] sm:$0xff]   ;;  %p878_p6 = scmp.ne.s32.totalorder %s516_s16, %s877_s20  ;;  %p883_p8 = scmp.lt.s32.totalorder %s877_s20, %s877_s20 }
  0x72   :  { %v727_v15 = vld [vmem:[#allocation2] sm:$0xff]   ;;  %v729_v16 = vld [vmem:[#allocation11] sm:$0xff]   ;;  %v738_v17 = vld [vmem:[#allocation10 + $0x30] sm:$0xff]  }
  0x73   :  { %v731_v18 = vld [vmem:[#allocation11 + $0x8] sm:$0xff]   ;;  %v740_v19 = vld [vmem:[#allocation10 + $0x38] sm:$0xff]   ;;  %v742_v20 = vld [vmem:[#allocation5] sm:$0xff]   ;;  %p884_p9 = por %p883_p8, %p882_p7 }
  0x74   :  { %648 = vmatpush3.bf16.msra.mxu0 %v719_v2  ;;  %668 = vmatpush3.bf16.msra.mxu1 %v728_v6  ;;  %v733_v21 = vld [vmem:[#allocation11 + $0x10] sm:$0xff]   ;;  %v735_v22 = vld [vmem:[#allocation11 + $0x18] sm:$0xff]   ;;  %v737_v23 = vld [vmem:[#allocation11 + $0x20] sm:$0xff]  }
  0x75   :  { %649 = vmatprep.subr.bf16.mxu0 %v963_v0  ;;  %669 = vmatprep.subr.bf16.mxu1 %v963_v0  ;;  %v739_v24 = vld [vmem:[#allocation11 + $0x28] sm:$0xff]   ;;  %v741_v25 = vld [vmem:[#allocation11 + $0x30] sm:$0xff]   ;;  %v743_v26 = vld [vmem:[#allocation11 + $0x38] sm:$0xff]   ;;  %p885_p10 = pnand %p884_p9, %p878_p6 }
  0x76   :  { %v744_v27 = vld [vmem:[#allocation7] sm:$0xff]   ;;  %v561_v28 = vld [vmem:[%s1227_s4] ss:$0 sm:$0xff] }
  0x77   :  { %v571_v36 = vld [vmem:[%s1229_s6] ss:$0 sm:$0xff] }
  0x78   :  { %650 = vmatpush3.bf16.msra.mxu0 %v720_v3  ;;  %670 = vmatpush3.bf16.msra.mxu1 %v730_v8 }
  0x79   :  { %651 = vmatprep.subr.bf16.mxu0 %v963_v0  ;;  %671 = vmatprep.subr.bf16.mxu1 %v963_v0 }
  0x7c   :  { %652 = vmatpush3.bf16.msra.mxu0 %v721_v5  ;;  %672 = vmatpush3.bf16.msra.mxu1 %v732_v10 }
  0x7d   :  { %653 = vmatprep.subr.bf16.mxu0 %v963_v0  ;;  %673 = vmatprep.subr.bf16.mxu1 %v963_v0 }
  0x80   :  { %654 = vmatpush3.bf16.msra.mxu0 %v722_v7  ;;  %674 = vmatpush3.bf16.msra.mxu1 %v734_v12 }
  0x81   :  { %655 = vmatprep.subr.bf16.mxu0 %v963_v0  ;;  %675 = vmatprep.subr.bf16.mxu1 %v963_v0 }
  0x84   :  { %656 = vmatpush3.bf16.msra.mxu0 %v723_v9  ;;  %676 = vmatpush3.bf16.msra.mxu1 %v736_v14 }
  0x85   :  { %657 = vmatprep.subr.bf16.mxu0 %v963_v0  ;;  %677 = vmatprep.subr.bf16.mxu1 %v963_v0 }
  0x88   :  { %658 = vmatpush3.bf16.msra.mxu0 %v724_v11  ;;  %678 = vmatpush3.bf16.msra.mxu1 %v738_v17 }
  0x89   :  { %659 = vmatprep.subr.bf16.mxu0 %v963_v0  ;;  %679 = vmatprep.subr.bf16.mxu1 %v963_v0 }
  0x8c   :  { %660 = vmatpush3.bf16.msra.mxu0 %v725_v13  ;;  %680 = vmatpush3.bf16.msra.mxu1 %v740_v19 }
  0x8d   :  { %685 = vmatprep.subr.bf16.mxu0 %v963_v0 }
  0x8f   :  { %662 = vmatmul.mubr.bf16.vlgmr.msra.gmra.mrb[0].mxu0 %v727_v15  ;;  %682 = vmatmul.mubr.bf16.vlgmr.msra.gmra.mrb[0].mxu1 %v742_v20 }
  0x90   :  { %686 = vmatpush3.bf16.msra.mxu0 %v729_v16  ;;  %701 = vmatprep.mubr.msk.bf16.mxu0 %vm964_vm0, %v963_v0 }
  0x91   :  { %687 = vmatprep.subr.bf16.mxu0 %v963_v0 }
  0x94   :  { %688 = vmatpush3.bf16.msra.mxu0 %v731_v18 }
  0x95   :  { %689 = vmatprep.subr.bf16.mxu0 %v963_v0 }
  0x98   :  { %690 = vmatpush3.bf16.msra.mxu0 %v733_v21 }
  0x99   :  { %691 = vmatprep.subr.bf16.mxu0 %v963_v0 }
  0x9c   :  { %692 = vmatpush3.bf16.msra.mxu0 %v735_v22 }
  0x9d   :  { %693 = vmatprep.subr.bf16.mxu0 %v963_v0 }
  0xa0   :  { %694 = vmatpush3.bf16.msra.mxu0 %v737_v23 }
  0xa1   :  { %695 = vmatprep.subr.bf16.mxu0 %v963_v0 }
  0xa4   :  { %696 = vmatpush3.bf16.msra.mxu0 %v739_v24 }
  0xa5   :  { %697 = vmatprep.subr.bf16.mxu0 %v963_v0 }
  0xa8   :  { %698 = vmatpush3.bf16.msra.mxu0 %v741_v25 }
  0xa9   :  { %699 = vmatprep.subr.bf16.mxu0 %v963_v0 }
  0xac   :  { %700 = vmatpush3.bf16.msra.mxu0 %v743_v26 }
  0xaf   :  { %702 = vmatmul.mubr.bf16.vlgmr.msra.gmra.mrb[4].mxu0 %v744_v27 }
 0x162   :  { %v233_v29 = vpop.f32.mrb[0].mxu0  ;;  %v353_v37 = vpop.f32.mrb[0].mxu1 }
 0x163   :  { %v234_v30 = vadd.f32 %v561_v28, %v233_v29  ;;  %v663_v31 = vpop.f32.mrb[1].mxu0 }
 0x164   :  { %v236_v32 = vpop.f32.mrb[2].mxu0 }
 0x165   :  { %v237_v33 = vadd.f32 %v561_v28, %v236_v32  ;;  %v664_v34 = vpop.f32.mrb[3].mxu0 }
 0x167   :  { %v606_v35 = vpack.c.bf16 %v237_v33, %v234_v30 }
 0x169   :  { %607 = vst [vmem:[#allocation13] sm:$0xff] %v606_v35  }
 0x16a   :  { %888 = shalt.err (!%p885_p10)
}
 0x16b   :  { %s889_s21 = scalar_lea.hbm %s1232_s9, 128 }
 0x16c   :  { %p890_p11 = scmp.ne.s32.totalorder %s1232_s9, %s889_s21  ;;  %p893_p12 = scmp.lt.u32.totalorder %s889_s21, %s1232_s9 }
 0x16e   :  { %p895_p13 = pnand %p893_p12, %p890_p11 }
 0x170   :  { %898 = shalt.err (!%p895_p13)
}
 0x171   :  { %521 = dma.vmem_to_hbm [thread:$0]  %s516_s16, 128, %s1232_s9, [#allocation4], %s957_s29, %s957_s29, %s958_s30   ;;  %v354_v38 = vadd.f32 %v571_v36, %v353_v37  ;;  %v683_v39 = vpop.f32.mrb[1].mxu1 }
 0x172   :  { %v356_v40 = vpop.f32.mrb[2].mxu1  ;;  %s966_s18 = smov [#allocation14]  }
 0x173   :  { %s527_s24 = sshll.u32 %s966_s18, 4  ;;  %v357_v41 = vadd.f32 %v571_v36, %v356_v40  ;;  %v684_v42 = vpop.f32.mrb[3].mxu1  ;;  %s528_s24 = int_to_ptr.vmem [resolvable:$true] %s527_s24 }
 0x174   :  { %s899_s26 = scalar_lea.vmem %s528_s24, 128  ;;  %p904_p1 = scmp.lt.s32.totalorder %s528_s24, %s528_s24 }
 0x175   :  { %v611_v43 = vpack.c.bf16 %v357_v41, %v354_v38  ;;  %p900_p0 = scmp.ne.s32.totalorder %s528_s24, %s899_s26  ;;  %p905_p2 = scmp.lt.s32.totalorder %s899_s26, %s899_s26 }
 0x177   :  { %612 = vst [vmem:[#allocation14] sm:$0xff] %v611_v43   ;;  %p906_p3 = por %p905_p2, %p904_p1 }
 0x179   :  { %p907_p4 = pnand %p906_p3, %p900_p0 }
 0x17b   :  { %910 = shalt.err (!%p907_p4)
}
 0x17c   :  { %s911_s9 = scalar_lea.hbm %s1233_s10, 128 }
 0x17d   :  { %p912_p5 = scmp.ne.s32.totalorder %s1233_s10, %s911_s9  ;;  %p915_p6 = scmp.lt.u32.totalorder %s911_s9, %s1233_s10 }
 0x17f   :  { %p917_p7 = pnand %p915_p6, %p912_p5 }
 0x181   :  { %920 = shalt.err (!%p917_p7)
}
 0x182   :  { %533 = dma.vmem_to_hbm [thread:$0]  %s528_s24, 128, %s1233_s10, [#allocation15], %s957_s29, %s957_s29, %s958_s30   ;;  %v473_v45 = vpop.f32.mrb[4].mxu0 }
 0x183   :  { %v581_v44 = vld [vmem:[%s1231_s8] ss:$0 sm:$0xff]  ;;  %v703_v46 = vpop.f32.mrb[5].mxu0  ;;  %s967_s17 = smov [#allocation16]  }
 0x184   :  { %v476_v47 = vpop.f32.mrb[6].mxu0  ;;  %s539_s3 = sshll.u32 %s967_s17, 4  ;;  %v474_v48 = vadd.f32 %v581_v44, %v473_v45  ;;  %s540_s3 = int_to_ptr.vmem [resolvable:$true] %s539_s3 }
 0x185   :  { %v477_v49 = vadd.f32 %v581_v44, %v476_v47  ;;  %v704_v50 = vpop.f32.mrb[7].mxu0  ;;  %s921_s20 = scalar_lea.vmem %s540_s3, 128  ;;  %p926_p9 = scmp.lt.s32.totalorder %s540_s3, %s540_s3 }
 0x186   :  { %p922_p8 = scmp.ne.s32.totalorder %s540_s3, %s921_s20  ;;  %p927_p10 = scmp.lt.s32.totalorder %s921_s20, %s921_s20 }
 0x187   :  { %v616_v51 = vpack.c.bf16 %v477_v49, %v474_v48 }
 0x188   :  { %p928_p11 = por %p927_p10, %p926_p9 }
 0x189   :  { %617 = vst [vmem:[#allocation16] sm:$0xff] %v616_v51  }
 0x18a   :  { %p929_p12 = pnand %p928_p11, %p922_p8 }
 0x18c   :  { %932 = shalt.err (!%p929_p12)
}
 0x18d   :  { %s933_s4 = scalar_lea.hbm %s1234_s11, 128 }
 0x18e   :  { %p934_p13 = scmp.ne.s32.totalorder %s1234_s11, %s933_s4  ;;  %p937_p0 = scmp.lt.u32.totalorder %s933_s4, %s1234_s11 }
 0x190   :  { %p939_p1 = pnand %p937_p0, %p934_p13 }
 0x192   :  { %942 = shalt.err (!%p939_p1)
}
 0x193   :  { %545 = dma.vmem_to_hbm [thread:$0]  %s540_s3, 128, %s1234_s11, [#allocation15], %s957_s29, %s957_s29, %s958_s30  }
 0x194   :  { %951 = dma.done.wait [#allocation4], 128  }
 0x195   :  { %952 = vsyncadd [#allocation4], 4294967168 }
 0x196   :  { %953 = dma.done.wait [#allocation15], 256  }
 0x197   :  { %954 = vsyncadd [#allocation15], 4294967040 }
 0x198   :  { %555 = vsyncpa [#allocation3], 1 }
 0x199   :  { %556 = vsyncpa [#allocation6], 1 }
 0x19a   :  { %557 = vsyncpa [#allocation9], 1 }
 0x19b   :  { %558 = vsyncpa [#allocation12], 1 }
 0x19c   :  { %559 = vsyncpa [#allocation4], 1 }
 0x19d   :  { %560 = vsyncpa [#allocation15], 1 }

</bundles_post_ra>
